<compile_context>
chip_gen: v7x
topology: tpu7x:2x2x1
jax: 0.10.0
libtpu: 0.0.40
codegen_flags: <defaults>
</compile_context>

<pallas_src>
import functools

import numpy as np

import jax
import jax.numpy as jnp
from jax import lax
from jax.experimental import pallas as pl
from jax.experimental.pallas import tpu as pltpu

_LANE = 128
_SUBLANE = 8


def _weighted_l1_kernel(pred_ref, targ_ref, out_ref, acc_ref, *,
                        edges, base_w, deltas, tile_rows, steps_per_core,
                        rows_total, bf16_compute):
    c = pl.program_id(0)          # (core-)parallel axis
    i = pl.program_id(1)          # sequential reduction axis

    @pl.when(i == 0)
    def _():
        acc_ref[...] = jnp.zeros_like(acc_ref)

    p = pred_ref[...]
    t = targ_ref[...]
    if bf16_compute:
        # bf16 VALU path (v6e / v7x): sub/abs + compares in bf16, f32 accum.
        # TODO(synk): bin edges not exactly representable in bf16 may shift
        # bucket boundaries by 1 ulp relative to torch's promoted compare.
        mae = jnp.abs(p - t).astype(jnp.float32)
        tcmp = t
        e_const = lambda e: jnp.bfloat16(e)
    else:
        p32 = p.astype(jnp.float32)
        t32 = t.astype(jnp.float32)
        mae = jnp.abs(p32 - t32)
        tcmp = t32
        e_const = lambda e: jnp.float32(e)

    # Staircase weight lookup (edges sorted): fuses bucketize + gather into
    # n_bins compare/select-adds with immediate constants.
    #   count of edges strictly < t  ==  torch.bucketize(t, edges, right=False)
    # TODO(synk): targets strictly greater than the last bin edge clamp to the
    # last bin weight here; torch.bucketize would index out of bounds and error.
    w = jnp.full(t.shape, jnp.float32(base_w), dtype=jnp.float32)
    for e, d in zip(edges, deltas):
        if d != 0.0:
            w = w + jnp.where(tcmp > e_const(e), jnp.float32(d),
                              jnp.float32(0.0))

    contrib = mae * w                                   # (tile_rows, 128) f32

    blk = c * steps_per_core + i
    rows_valid = rows_total - blk * tile_rows           # rows of real data

    # Interior blocks: unmasked fast path (no iota / compare / select).
    @pl.when(rows_valid >= tile_rows)
    def _():
        acc_ref[...] += contrib.reshape(tile_rows // _SUBLANE, _SUBLANE,
                                        _LANE).sum(axis=0)

    # Edge blocks only: ragged tail rows and clamped duplicate blocks.
    @pl.when(rows_valid < tile_rows)
    def _():
        row_i = lax.broadcasted_iota(jnp.int32, contrib.shape, 0)
        masked = jnp.where(row_i < rows_valid, contrib, jnp.float32(0.0))
        acc_ref[...] += masked.reshape(tile_rows // _SUBLANE, _SUBLANE,
                                       _LANE).sum(axis=0)

    @pl.when(i == pl.num_programs(1) - 1)
    def _():
        out_ref[...] = jnp.full((1, 1, 1), jnp.sum(acc_ref[...]),
                                dtype=jnp.float32)


def _dim_semantics(num_cores):
    # Only CORE_PARALLEL actually shards the leading grid axis across the two
    # TensorCores of a v7x chip; everywhere else fall back to plain "parallel"
    # (harmless, identical codegen on single-TC v5e / v6e).
    kind = ""
    try:
        kind = jax.devices()[0].device_kind.lower()
    except Exception:
        pass
    if (num_cores > 1 and ("v7" in kind or "7x" in kind)
            and hasattr(pltpu, "CORE_PARALLEL")):
        return (pltpu.CORE_PARALLEL, pltpu.ARBITRARY)
    return ("parallel", "arbitrary")


def weighted_l1_loss(predictions, targets, bin_edges, bin_weights, *,
                     tile_rows=4096, num_cores=2):
    """Scalar weighted-L1 loss. bin_edges: (n_bins+1,), bin_weights: (n_bins,)."""
    edges = np.asarray(bin_edges, dtype=np.float64).reshape(-1)
    weights = np.asarray(bin_weights, dtype=np.float64).reshape(-1)
    n_bins = int(weights.shape[0])
    assert edges.shape[0] - 1 == n_bins, \
        "Number of bins must match number of weights"

    # Host-precomputed staircase deltas (baked into the kernel as immediates).
    # Last edge is dropped: targets above it clamp to the last bin weight.
    base_w = float(weights[-1])
    deltas = [float(weights[0] - weights[-1])]
    for j in range(1, n_bins):
        deltas.append(float(weights[j] - weights[j - 1]))
    edge_list = [float(e) for e in edges[:-1]]

    n_total = int(predictions.size)
    pred = predictions.reshape(-1)               # keep original dtype (no upcast)
    targ = targets.reshape(-1)
    bf16_compute = (pred.dtype == jnp.bfloat16)

    # Pad to a multiple of 8*128 elements so rows is sublane aligned; padded
    # zeros give mae == 0 and therefore never contribute to the sum.
    pad = (-n_total) % (_SUBLANE * _LANE)
    if pad:
        pred = jnp.pad(pred, (0, pad))
        targ = jnp.pad(targ, (0, pad))
    rows = (n_total + pad) // _LANE              # multiple of 8
    pred2 = pred.reshape(rows, _LANE)
    targ2 = targ.reshape(rows, _LANE)

    # Tile sizing: big blocks (amortize the ~0.35us/step overhead), sublane
    # aligned, clamped to the array.
    tile_rows = max(_SUBLANE, (min(int(tile_rows), rows) // _SUBLANE) * _SUBLANE)
    num_blocks = (rows + tile_rows - 1) // tile_rows
    num_cores = max(1, min(num_cores, num_blocks))
    steps_per_core = (num_blocks + num_cores - 1) // num_cores
    max_block = num_blocks - 1

    # VMEM budget: 2 inputs x 2 pipeline buffers + headroom for the f32
    # elementwise intermediates of one block; capped below v7x's 64 MiB/TC.
    itemsize = int(np.dtype(pred2.dtype).itemsize)
    block_in_bytes = tile_rows * _LANE * itemsize
    block_f32_bytes = tile_rows * _LANE * 4
    vmem_limit = 4 * block_in_bytes + 8 * block_f32_bytes + (2 << 20)
    vmem_limit = int(max(32 << 20, min(vmem_limit, 48 << 20)))

    kernel = functools.partial(
        _weighted_l1_kernel,
        edges=tuple(edge_list), base_w=base_w, deltas=tuple(deltas),
        tile_rows=tile_rows, steps_per_core=steps_per_core,
        rows_total=rows, bf16_compute=bf16_compute)

    def in_map(c, i):
        # Clamp so the DMA never targets a fully out-of-range block; any
        # duplicated / ragged data is zeroed by the in-kernel edge-block mask.
        return (jnp.minimum(c * steps_per_core + i, max_block), 0)

    partials = pl.pallas_call(
        kernel,
        out_shape=jax.ShapeDtypeStruct((num_cores, 1, 1), jnp.float32),
        grid=(num_cores, steps_per_core),
        in_specs=[
            pl.BlockSpec((tile_rows, _LANE), in_map),      # predictions
            pl.BlockSpec((tile_rows, _LANE), in_map),      # targets
        ],
        out_specs=pl.BlockSpec((1, 1, 1), lambda c, i: (c, 0, 0)),
        scratch_shapes=[pltpu.VMEM((_SUBLANE, _LANE), jnp.float32)],
        compiler_params=pltpu.CompilerParams(
            dimension_semantics=_dim_semantics(num_cores),
            vmem_limit_bytes=vmem_limit),
    )(pred2, targ2)

    return jnp.sum(partials) / jnp.float32(n_total)


def _reference(predictions, targets, bin_edges, bin_weights):
    mae = jnp.abs(predictions - targets)
    idx = jnp.searchsorted(bin_edges, targets, side="left") - 1
    n_bins = bin_weights.shape[0]
    idx = jnp.where(idx < 0, idx + n_bins, idx)      # torch negative-index wrap
    return jnp.mean(mae * bin_weights[idx])          # OOB gather clamps (= kernel)


if __name__ == "__main__":
    key = jax.random.PRNGKey(0)
    k1, k2 = jax.random.split(key)

    # Deterministic "parameters" of the module (n_bins = 4).
    bin_edges = jnp.array([0.0, 0.25, 0.5, 0.75, 1.0], dtype=jnp.float32)
    bin_weights = jnp.array([1.0, 2.0, 3.0, 4.0], dtype=jnp.float32)

    # Small example inputs (loss is elementwise; shape chosen as NCHW-like).
    x_shape = (2, 4, 16, 16)
    predictions = jax.random.uniform(k1, x_shape, dtype=jnp.float32,
                                     minval=0.01, maxval=0.99)
    targets = jax.random.uniform(k2, x_shape, dtype=jnp.float32,
                                 minval=0.01, maxval=0.99)

    loss = weighted_l1_loss(predictions, targets, bin_edges, bin_weights)
    loss = jax.block_until_ready(loss)

    ref = _reference(predictions, targets, bin_edges, bin_weights)
    assert jnp.allclose(loss, ref, rtol=1e-5, atol=1e-6), (loss, ref)

    print("KERNEL_OK")
</pallas_src>

<mosaic_0001>
module attributes {stable_mosaic.version = 11 : i64} {
  func.func @_weighted_l1_kernel(%arg0: i32, %arg1: i32, %arg2: memref<16x128xf32, #tpu.memory_space<vmem>>, %arg3: memref<16x128xf32, #tpu.memory_space<vmem>>, %arg4: memref<1x1x1xf32, #tpu.memory_space<vmem>>, %arg5: memref<8x128xf32, #tpu.memory_space<vmem>>) attributes {dimension_semantics = [#tpu.dimension_semantics<parallel>, #tpu.dimension_semantics<arbitrary>], iteration_bounds = array<i64: 1, 1>, scalar_prefetch = 0 : i64, scratch_operands = 1 : i64, tpu.core_type = #tpu.core_type<tc>, window_params = [{transform_indices = @transform_0, window_bounds = array<i64: 16, 128>}, {transform_indices = @transform_1, window_bounds = array<i64: 16, 128>}, {transform_indices = @transform_2, window_bounds = array<i64: 1, 1, 1>}]} {
    %c0_i32 = arith.constant 0 : i32
    %0 = arith.cmpi eq, %arg1, %c0_i32 : i32
    %1 = arith.extui %0 : i1 to i32
    %c0_i32_0 = arith.constant 0 : i32
    %2 = arith.cmpi ne, %1, %c0_i32_0 : i32
    scf.if %2 {
      %cst_23 = arith.constant 0.000000e+00 : f32
      %46 = vector.broadcast %cst_23 : f32 to vector<8x128xf32>
      %c0_24 = arith.constant 0 : index
      %c0_25 = arith.constant 0 : index
      %47 = vector.load %arg5[%c0_24, %c0_25] : memref<8x128xf32, #tpu.memory_space<vmem>>, vector<8x128xf32>
      tpu.vector_store %arg5[%c0_24, %c0_25], %46 {strides = array<i32>} : memref<8x128xf32, #tpu.memory_space<vmem>>, vector<8x128xf32>,
    } else {
    }
    %c0 = arith.constant 0 : index
    %c0_1 = arith.constant 0 : index
    %3 = vector.load %arg2[%c0, %c0_1] : memref<16x128xf32, #tpu.memory_space<vmem>>, vector<16x128xf32>
    %c0_2 = arith.constant 0 : index
    %c0_3 = arith.constant 0 : index
    %4 = vector.load %arg3[%c0_2, %c0_3] : memref<16x128xf32, #tpu.memory_space<vmem>>, vector<16x128xf32>
    %5 = arith.subf %3, %4 : vector<16x128xf32>
    %6 = math.absf %5 : vector<16x128xf32>
    %cst = arith.constant 4.000000e+00 : f32
    %7 = vector.broadcast %cst : f32 to vector<16x128xf32>
    %cst_4 = arith.constant 0.000000e+00 : f32
    %8 = vector.broadcast %cst_4 : f32 to vector<16x128xf32>
    %9 = arith.cmpf ogt, %4, %8 : vector<16x128xf32>
    %cst_5 = arith.constant -3.000000e+00 : f32
    %cst_6 = arith.constant 0.000000e+00 : f32
    %10 = vector.broadcast %cst_5 : f32 to vector<16x128xf32>
    %11 = vector.broadcast %cst_6 : f32 to vector<16x128xf32>
    %12 = arith.select %9, %10, %11 : vector<16x128xi1>, vector<16x128xf32>
    %13 = arith.addf %7, %12 : vector<16x128xf32>
    %cst_7 = arith.constant 2.500000e-01 : f32
    %14 = vector.broadcast %cst_7 : f32 to vector<16x128xf32>
    %15 = arith.cmpf ogt, %4, %14 : vector<16x128xf32>
    %cst_8 = arith.constant 1.000000e+00 : f32
    %cst_9 = arith.constant 0.000000e+00 : f32
    %16 = vector.broadcast %cst_8 : f32 to vector<16x128xf32>
    %17 = vector.broadcast %cst_9 : f32 to vector<16x128xf32>
    %18 = arith.select %15, %16, %17 : vector<16x128xi1>, vector<16x128xf32>
    %19 = arith.addf %13, %18 : vector<16x128xf32>
    %cst_10 = arith.constant 5.000000e-01 : f32
    %20 = vector.broadcast %cst_10 : f32 to vector<16x128xf32>
    %21 = arith.cmpf ogt, %4, %20 : vector<16x128xf32>
    %cst_11 = arith.constant 1.000000e+00 : f32
    %cst_12 = arith.constant 0.000000e+00 : f32
    %22 = vector.broadcast %cst_11 : f32 to vector<16x128xf32>
    %23 = vector.broadcast %cst_12 : f32 to vector<16x128xf32>
    %24 = arith.select %21, %22, %23 : vector<16x128xi1>, vector<16x128xf32>
    %25 = arith.addf %19, %24 : vector<16x128xf32>
    %cst_13 = arith.constant 7.500000e-01 : f32
    %26 = vector.broadcast %cst_13 : f32 to vector<16x128xf32>
    %27 = arith.cmpf ogt, %4, %26 : vector<16x128xf32>
    %cst_14 = arith.constant 1.000000e+00 : f32
    %cst_15 = arith.constant 0.000000e+00 : f32
    %28 = vector.broadcast %cst_14 : f32 to vector<16x128xf32>
    %29 = vector.broadcast %cst_15 : f32 to vector<16x128xf32>
    %30 = arith.select %27, %28, %29 : vector<16x128xi1>, vector<16x128xf32>
    %31 = arith.addf %25, %30 : vector<16x128xf32>
    %32 = arith.mulf %6, %31 : vector<16x128xf32>
    %c1_i32 = arith.constant 1 : i32
    %33 = arith.muli %arg0, %c1_i32 : i32
    %34 = arith.addi %33, %arg1 : i32
    %c16_i32 = arith.constant 16 : i32
    %35 = arith.muli %34, %c16_i32 : i32
    %c16_i32_16 = arith.constant 16 : i32
    %36 = arith.subi %c16_i32_16, %35 : i32
    %c16_i32_17 = arith.constant 16 : i32
    %37 = arith.cmpi sge, %36, %c16_i32_17 : i32
    %38 = arith.extui %37 : i1 to i32
    %c0_i32_18 = arith.constant 0 : i32
    %39 = arith.cmpi ne, %38, %c0_i32_18 : i32
    scf.if %39 {
      %c0_23 = arith.constant 0 : index
      %c0_24 = arith.constant 0 : index
      %46 = vector.load %arg5[%c0_23, %c0_24] : memref<8x128xf32, #tpu.memory_space<vmem>>, vector<8x128xf32>
      %47 = vector.shape_cast %32 : vector<16x128xf32> to vector<2x8x128xf32>
      %cst_25 = arith.constant dense<0.000000e+00> : vector<8x128xf32>
      %48 = vector.multi_reduction <add>, %47, %cst_25 [0] : vector<2x8x128xf32> to vector<8x128xf32>
      %49 = arith.addf %46, %48 : vector<8x128xf32>
      %c0_26 = arith.constant 0 : index
      %c0_27 = arith.constant 0 : index
      %50 = vector.load %arg5[%c0_26, %c0_27] : memref<8x128xf32, #tpu.memory_space<vmem>>, vector<8x128xf32>
      tpu.vector_store %arg5[%c0_26, %c0_27], %49 {strides = array<i32>} : memref<8x128xf32, #tpu.memory_space<vmem>>, vector<8x128xf32>,
    } else {
    }
    %c16_i32_19 = arith.constant 16 : i32
    %40 = arith.cmpi slt, %36, %c16_i32_19 : i32
    %41 = arith.extui %40 : i1 to i32
    %c0_i32_20 = arith.constant 0 : i32
    %42 = arith.cmpi ne, %41, %c0_i32_20 : i32
    scf.if %42 {
      %46 = tpu.iota {dimensions = array<i32: 0>} : vector<16x128xi32>
      %47 = vector.broadcast %36 : i32 to vector<16x128xi32>
      %48 = arith.cmpi slt, %46, %47 : vector<16x128xi32>
      %cst_23 = arith.constant 0.000000e+00 : f32
      %49 = vector.broadcast %cst_23 : f32 to vector<16x128xf32>
      %50 = arith.select %48, %32, %49 : vector<16x128xi1>, vector<16x128xf32>
      %c0_24 = arith.constant 0 : index
      %c0_25 = arith.constant 0 : index
      %51 = vector.load %arg5[%c0_24, %c0_25] : memref<8x128xf32, #tpu.memory_space<vmem>>, vector<8x128xf32>
      %52 = vector.shape_cast %50 : vector<16x128xf32> to vector<2x8x128xf32>
      %cst_26 = arith.constant dense<0.000000e+00> : vector<8x128xf32>
      %53 = vector.multi_reduction <add>, %52, %cst_26 [0] : vector<2x8x128xf32> to vector<8x128xf32>
      %54 = arith.addf %51, %53 : vector<8x128xf32>
      %c0_27 = arith.constant 0 : index
      %c0_28 = arith.constant 0 : index
      %55 = vector.load %arg5[%c0_27, %c0_28] : memref<8x128xf32, #tpu.memory_space<vmem>>, vector<8x128xf32>
      tpu.vector_store %arg5[%c0_27, %c0_28], %54 {strides = array<i32>} : memref<8x128xf32, #tpu.memory_space<vmem>>, vector<8x128xf32>,
    } else {
    }
    %c0_i32_21 = arith.constant 0 : i32
    %43 = arith.cmpi eq, %arg1, %c0_i32_21 : i32
    %44 = arith.extui %43 : i1 to i32
    %c0_i32_22 = arith.constant 0 : i32
    %45 = arith.cmpi ne, %44, %c0_i32_22 : i32
    scf.if %45 {
      %c0_23 = arith.constant 0 : index
      %c0_24 = arith.constant 0 : index
      %46 = vector.load %arg5[%c0_23, %c0_24] : memref<8x128xf32, #tpu.memory_space<vmem>>, vector<8x128xf32>
      %47 = vector.shape_cast %46 : vector<8x128xf32> to vector<1x8x128xf32>
      %cst_25 = arith.constant dense<0.000000e+00> : vector<1xf32>
      %48 = vector.multi_reduction <add>, %47, %cst_25 [1, 2] : vector<1x8x128xf32> to vector<1xf32>
      %49 = vector.shape_cast %48 : vector<1xf32> to vector<1x1x1xf32>
      %50 = vector.extract %49[0, 0, 0] : f32 from vector<1x1x1xf32>
      %51 = vector.broadcast %50 : f32 to vector<1x1x1xf32>
      %c0_26 = arith.constant 0 : index
      %c0_27 = arith.constant 0 : index
      %c0_28 = arith.constant 0 : index
      %52 = vector.load %arg4[%c0_26, %c0_27, %c0_28] : memref<1x1x1xf32, #tpu.memory_space<vmem>>, vector<1x1x1xf32>
      tpu.vector_store %arg4[%c0_26, %c0_27, %c0_28], %51 {strides = array<i32>} : memref<1x1x1xf32, #tpu.memory_space<vmem>>, vector<1x1x1xf32>,
    } else {
    }
    return
  }
  func.func @transform_0(%arg0: i32, %arg1: i32) -> (i32, i32) {
    %c1_i32 = arith.constant 1 : i32
    %0 = arith.muli %arg0, %c1_i32 : i32
    %1 = arith.addi %0, %arg1 : i32
    %c0_i32 = arith.constant 0 : i32
    %2 = arith.minsi %1, %c0_i32 : i32
    %c0_i32_0 = arith.constant 0 : i32
    %c0_i32_1 = arith.constant 0 : i32
    return %2, %c0_i32_0 : i32, i32
  }
  func.func @transform_1(%arg0: i32, %arg1: i32) -> (i32, i32) {
    %c1_i32 = arith.constant 1 : i32
    %0 = arith.muli %arg0, %c1_i32 : i32
    %1 = arith.addi %0, %arg1 : i32
    %c0_i32 = arith.constant 0 : i32
    %2 = arith.minsi %1, %c0_i32 : i32
    %c0_i32_0 = arith.constant 0 : i32
    %c0_i32_1 = arith.constant 0 : i32
    return %2, %c0_i32_0 : i32, i32
  }
  func.func @transform_2(%arg0: i32, %arg1: i32) -> (i32, i32, i32) {
    %c0_i32 = arith.constant 0 : i32
    %c0_i32_0 = arith.constant 0 : i32
    %c0_i32_1 = arith.constant 0 : i32
    return %arg0, %c0_i32, %c0_i32_0 : i32, i32, i32
  }
}

</mosaic_0001>

<bundles_post_ra>
// kernel: tpu_custom_call.1
= control target key start
LH: loop header
LB: loop body
LE: loop exit
PB: predicated region body
PF: predicated region fallthrough
CT: control target
= control target key end

     0   :  { %7 = vsyncpa [#allocation4], 0  ;;  %s299_s0 = inlined_call_operand.hbm [shape: f32[16,128], index: 0, kind: input, shape index: {}]   ;;  %s300_s1 = inlined_call_operand.hbm [shape: f32[16,128], index: 1, kind: input, shape index: {}]   ;;  %s301_s2 = inlined_call_operand.hbm [shape: f32[1,1,1], index: 2, kind: output, shape index: {}]  }
   0x1   :  { %8 = vsyncpa [#allocation7], 0 }
   0x2   :  { %9 = vsyncpa [#allocation5], 0  ;;  %s242_s9 = smov [#allocation3]   ;;  %s170_s13 = scalar_lea.hbm %s299_s0, 256 }
   0x3   :  { %s21_s10 = sshll.u32 %s242_s9, 4  ;;  %p171_p0 = scmp.ne.s32.totalorder %s299_s0, %s170_s13  ;;  %s22_s10 = int_to_ptr.vmem [resolvable:$true] %s21_s10 }
   0x4   :  { %p174_p1 = scmp.lt.u32.totalorder %s170_s13, %s299_s0 }
   0x6   :  { %p176_p2 = pnand %p174_p1, %p171_p0 }
   0x8   :  { %179 = shalt.err (!%p176_p2)
}
   0x9   :  { %s180_s18 = scalar_lea.vmem %s22_s10, 256  ;;  %p185_p4 = scmp.lt.s32.totalorder %s22_s10, %s22_s10 }
   0xa   :  { %p181_p3 = scmp.ne.s32.totalorder %s22_s10, %s180_s18  ;;  %p186_p5 = scmp.lt.s32.totalorder %s180_s18, %s180_s18 }
   0xc   :  { %p187_p6 = por %p186_p5, %p185_p4 }
   0xe   :  { %p188_p7 = pnand %p187_p6, %p181_p3 }
  0x10   :  { %191 = shalt.err (!%p188_p7)
}
  0x11   :  { %s243_s19 = smov 128   ;;  %s244_s20 = smov 8  }
  0x12   :  { %27 = dma.hbm_to_vmem [thread:$0]  %s299_s0, 256, %s22_s10, [#allocation4], %s243_s19, %s243_s19, %s244_s20  }
  0x13   :  { %s245_s23 = smov [#allocation6]   ;;  %s192_s27 = scalar_lea.hbm %s300_s1, 256 }
  0x14   :  { %s39_s24 = sshll.u32 %s245_s23, 4  ;;  %p193_p8 = scmp.ne.s32.totalorder %s300_s1, %s192_s27  ;;  %s40_s24 = int_to_ptr.vmem [resolvable:$true] %s39_s24 }
  0x15   :  { %p196_p9 = scmp.lt.u32.totalorder %s192_s27, %s300_s1 }
  0x17   :  { %p198_p10 = pnand %p196_p9, %p193_p8 }
  0x19   :  { %201 = shalt.err (!%p198_p10)
}
  0x1a   :  { %s202_s4 = scalar_lea.vmem %s40_s24, 256  ;;  %p207_p12 = scmp.lt.s32.totalorder %s40_s24, %s40_s24 }
  0x1b   :  { %p203_p11 = scmp.ne.s32.totalorder %s40_s24, %s202_s4  ;;  %p208_p13 = scmp.lt.s32.totalorder %s202_s4, %s202_s4 }
  0x1d   :  { %p209_p0 = por %p208_p13, %p207_p12 }
  0x1f   :  { %p210_p1 = pnand %p209_p0, %p203_p11 }
  0x21   :  { %213 = shalt.err (!%p210_p1)
}
  0x22   :  { %45 = dma.hbm_to_vmem [thread:$0]  %s300_s1, 256, %s40_s24, [#allocation7], %s243_s19, %s243_s19, %s244_s20  }
  0x23   :  { %236 = dma.done.wait [#allocation4], 256  }
  0x24   :  { %237 = vsyncadd [#allocation4], 4294967040 }
  0x25   :  { %238 = dma.done.wait [#allocation7], 256  }
  0x26   :  { %239 = vsyncadd [#allocation7], 4294967040  ;;  %v65_v0 = vld [vmem:[#allocation3] sm:$0xff]  ;;  %v67_v1 = vld [vmem:[#allocation6] sm:$0xff]  ;;  %v246_v4 = vmov 0.0   ;;  %s247_s1 = smov [#allocation8]  }
  0x27   :  { %v66_v2 = vld [vmem:[#allocation3 + $0x8] sm:$0xff]  ;;  %v68_v3 = vld [vmem:[#allocation6 + $0x8] sm:$0xff]  ;;  %vm73_vm0 = vcmp.gt.f32.partialorder %v67_v1, 0.0  ;;  %vm79_vm1 = vcmp.gt.f32.partialorder %v67_v1, 0.25  ;;  %vm85_vm4 = vcmp.gt.f32.partialorder %v67_v1, 0.5  ;;  %v69_v6 = vsub.f32 %v65_v0, %v67_v1  ;;  %s148_s6 = sshll.u32 %s247_s1, 4  ;;  %s149_s6 = int_to_ptr.vmem [resolvable:$true] %s148_s6 }
  0x28   :  { %vm74_vm2 = vcmp.gt.f32.partialorder %v68_v3, 0.0  ;;  %v75_v5 = vsel %vm73_vm0, -3.0, %v246_v4  ;;  %vm80_vm3 = vcmp.gt.f32.partialorder %v68_v3, 0.25  ;;  %v81_v9 = vsel %vm79_vm1, 1.0, %v246_v4  ;;  %s214_s8 = scalar_lea.vmem %s149_s6, 16  ;;  %s218_s9 = scalar_lea.vmem %s149_s6, 32 }
  0x29   :  { %v76_v7 = vsel %vm74_vm2, -3.0, %v246_v4  ;;  %v77_v8 = vadd.f32 4.0, %v75_v5  ;;  %v70_v10 = vsub.f32 %v66_v2, %v68_v3  ;;  %v82_v12 = vsel %vm80_vm3, 1.0, %v246_v4  ;;  %p215_p2 = scmp.ne.s32.totalorder %s149_s6, %s214_s8  ;;  %p219_p3 = scmp.lt.s32.totalorder %s149_s6, %s149_s6 }
  0x2a   :  { %v78_v11 = vadd.f32 4.0, %v76_v7  ;;  %vm86_vm5 = vcmp.gt.f32.partialorder %v68_v3, 0.5  ;;  %v87_v14 = vsel %vm85_vm4, 1.0, %v246_v4  ;;  %vm91_vm6 = vcmp.gt.f32.partialorder %v67_v1, 0.75  ;;  %p220_p4 = scmp.lt.s32.totalorder %s218_s9, %s214_s8 }
  0x2b   :  { %v83_v13 = vadd.f32 %v81_v9, %v77_v8  ;;  %v88_v15 = vsel %vm86_vm5, 1.0, %v246_v4  ;;  %vm92_vm7 = vcmp.gt.f32.partialorder %v68_v3, 0.75  ;;  %v93_v17 = vsel %vm91_vm6, 1.0, %v246_v4 }
  0x2c   :  { %v84_v16 = vadd.f32 %v82_v12, %v78_v11  ;;  %v71_v18 = vand.u32 2147483647, %v69_v6  ;;  %v94_v20 = vsel %vm92_vm7, 1.0, %v246_v4  ;;  %v72_v21 = vand.u32 2147483647, %v70_v10  ;;  %p221_p5 = por %p220_p4, %p219_p3 }
  0x2d   :  { %v89_v19 = vadd.f32 %v87_v14, %v83_v13  ;;  %vm140_vm8 = vcmask 0  }
  0x2e   :  { %v90_v22 = vadd.f32 %v88_v15, %v84_v16  ;;  %p222_p6 = pnand %p221_p5, %p215_p2 }
  0x2f   :  { %v95_v23 = vadd.f32 %v93_v17, %v89_v19 }
  0x30   :  { %v96_v24 = vadd.f32 %v94_v20, %v90_v22 }
  0x31   :  { %v97_v25 = vmul.f32 %v95_v23, %v71_v18 }
  0x32   :  { %v98_v26 = vmul.f32 %v96_v24, %v72_v21 }
  0x34   :  { %v107_v27 = vadd.f32 %v98_v26, %v97_v25 }
  0x36   :  { %130 = vadd.xlane.f32.xlu0 %v107_v27 }
  0xc3   :  { %v131_v28 = vpop.xlane.xlu0 %130 }
  0xc4   :  { %v132_v29 = vrot.slane %v131_v28, 4 }
  0xc6   :  { %v133_v30 = vadd.f32 %v132_v29, %v131_v28 }
  0xc8   :  { %v134_v31 = vrot.slane %v133_v30, 2 }
  0xca   :  { %v135_v32 = vadd.f32 %v134_v31, %v133_v30 }
  0xcc   :  { %v136_v33 = vrot.slane %v135_v32, 1 }
  0xce   :  { %v137_v34 = vadd.f32 %v136_v33, %v135_v32 }
  0xd0   :  { %162 = vpush %v137_v34 }
 0x101   :  { %s163_s7 = spop %162 }
 0x102   :  { %v139_v35 = vstv %s163_s7 }
 0x103   :  { %141 = vst.msk [vmem:[#allocation8] sm:$0x1] %vm140_vm8, %v139_v35 }
 0x104   :  { %225 = shalt.err (!%p222_p6)
}
 0x105   :  { %s226_s12 = scalar_lea.hbm %s301_s2, 16 }
 0x106   :  { %p227_p7 = scmp.ne.s32.totalorder %s301_s2, %s226_s12  ;;  %p230_p8 = scmp.lt.u32.totalorder %s226_s12, %s301_s2 }
 0x108   :  { %p232_p9 = pnand %p230_p8, %p227_p7 }
 0x10a   :  { %235 = shalt.err (!%p232_p9)
}
 0x10b   :  { %151 = dma.vmem_to_hbm [thread:$0]  %s149_s6, 16, %s301_s2, [#allocation5]  }
 0x10c   :  { %240 = dma.done.wait [#allocation5], 16  }
 0x10d   :  { %241 = vsyncadd [#allocation5], 4294967280 }
 0x10e   :  { %155 = vsyncpa [#allocation4], 1 }
 0x10f   :  { %156 = vsyncpa [#allocation7], 1 }
 0x110   :  { %157 = vsyncpa [#allocation5], 1 }

</bundles_post_ra>
